<compile_context>
chip_gen: v7x
topology: tpu7x:2x2x1
jax: 0.10.0
libtpu: 0.0.40
codegen_flags: <defaults>
</compile_context>

<pallas_src>
import functools

import numpy as np

import jax
import jax.numpy as jnp
from jax import lax
from jax.experimental import pallas as pl
from jax.experimental.pallas import tpu as pltpu


def _round_up(x, m):
    return ((x + m - 1) // m) * m


# ---------------------------------------------------------------------------
# rbf kernel: one (tile x tile) block of the symmetric [N, N] pairwise matrix.
# ---------------------------------------------------------------------------
def _mmd_rbf_tile_kernel(ti_ref, tj_ref,            # scalar-prefetch tile ids (SMEM)
                         row_ref, col_ref,          # [tile, D] feature blocks
                         sqc_ref, sqr_ref,          # [tile,1] / [1,tile] ||x||^2
                         wc_ref, wr_ref,            # [tile,1] / [1,tile] quadrant weights
                         bw_ref,                    # (1,1) SMEM: -1/bandwidth
                         out_ref,                   # (1,1) SMEM output
                         acc_ref,                   # (1,1) SMEM scratch accumulator
                         *, kernel_mul, kernel_num):
    t = pl.program_id(0)
    i = ti_ref[t]
    j = tj_ref[t]

    @pl.when(t == 0)
    def _():
        acc_ref[0, 0] = jnp.float32(0.0)

    # Gram block on the MXU: native operand dtype, f32 accumulation.
    g = lax.dot_general(row_ref[...], col_ref[...],
                        (((1,), (1,)), ((), ())),
                        preferred_element_type=jnp.float32)        # [tile, tile]

    # Pairwise squared distances; clamp cancellation noise so exp(.) <= 1,
    # matching the (x - y)^2 formulation of the reference.
    l2 = jnp.maximum(sqc_ref[...] + sqr_ref[...] - 2.0 * g, 0.0)

    # Multi-scale RBF accumulated elementwise: one weighted reduction at the
    # end instead of kernel_num full [tile, tile] reductions per scale.
    neg_inv_bw = bw_ref[0, 0]
    k_acc = jnp.zeros_like(l2)
    for s in range(kernel_num):            # static unroll, kernel_num is small
        k_acc = k_acc + jnp.exp(l2 * (neg_inv_bw * float(kernel_mul ** (-s))))

    # Quadrant weights are a rank-1 outer product (+1/b source, -1/m target,
    # 0 padding), so padded rows/cols and the XX/YY/XY/YX signs come out of a
    # single broadcasted multiply -- no per-tile iota/select masks.
    contrib = jnp.sum(k_acc * wc_ref[...] * wr_ref[...])

    # Only j >= i tiles are scheduled; off-diagonal tiles also stand in for
    # their transposed twin (the pairwise matrix and the weights are symmetric).
    factor = jnp.where(i == j, jnp.float32(1.0), jnp.float32(2.0))
    acc_ref[0, 0] += factor * contrib

    @pl.when(t == pl.num_programs(0) - 1)
    def _():
        out_ref[0, 0] = acc_ref[0, 0]


def _mmd_rbf(source, target, *, kernel_mul, kernel_num, tile=256):
    b, d = source.shape
    m, d2 = target.shape
    assert d == d2, "source/target feature dims must match"
    n = b + m

    total = jnp.concatenate([source, target], axis=0)               # [N, D]
    total_f32 = total.astype(jnp.float32)

    # O(N*D) bandwidth pre-pass (plain JAX): analytic sum of the full [N, N]
    # L2 matrix without materializing it.
    sq = jnp.sum(total_f32 * total_f32, axis=1)                     # [N]
    trace_g = jnp.sum(sq)
    sum_g = jnp.sum(jnp.square(jnp.sum(total_f32, axis=0)))
    sum_l2 = 2.0 * float(n) * trace_g - 2.0 * sum_g
    bandwidth = sum_l2 / float(n * n - n)
    bandwidth = bandwidth / float(kernel_mul ** (kernel_num // 2))
    # Guard the degenerate source == target case (PyTorch would NaN here);
    # documented behavioral difference.
    bandwidth = jnp.maximum(bandwidth, jnp.float32(1e-12))
    neg_inv_bw = (-1.0 / bandwidth).reshape(1, 1).astype(jnp.float32)

    # Tile choice + row padding: one 8-aligned block when everything fits in a
    # single tile, otherwise 128/256-aligned blocks so the [1, tile] lane-dim
    # BlockSpecs satisfy the (8, 128) constraint.
    if n <= tile:
        tile = _round_up(n, 8)
    else:
        assert tile % 128 == 0, "tile must be a multiple of 128 when tiling"
    n_pad = _round_up(n, tile)
    nblk = n_pad // tile
    pad = n_pad - n

    total_p = jnp.pad(total, ((0, pad), (0, 0)))                    # [Np, D]
    sq_p = jnp.pad(sq, (0, pad))
    sq_col = sq_p[:, None]                                          # [Np, 1]
    sq_row = sq_p[None, :]                                          # [1, Np]

    # Rank-1 quadrant weights: w(r, c) = wvec[r] * wvec[c].
    wvec = jnp.concatenate([
        jnp.full((b,), 1.0 / b, jnp.float32),
        jnp.full((m,), -1.0 / m, jnp.float32),
        jnp.zeros((pad,), jnp.float32),
    ])
    w_col = wvec[:, None]                                           # [Np, 1]
    w_row = wvec[None, :]                                           # [1, Np]

    # Upper-triangular tile schedule (j >= i) via scalar prefetch.
    pairs = [(i, j) for i in range(nblk) for j in range(i, nblk)]
    tile_i = jnp.asarray([p[0] for p in pairs], jnp.int32)
    tile_j = jnp.asarray([p[1] for p in pairs], jnp.int32)
    nsteps = len(pairs)

    kern = functools.partial(_mmd_rbf_tile_kernel,
                             kernel_mul=float(kernel_mul),
                             kernel_num=int(kernel_num))

    smem = pl.BlockSpec(memory_space=pltpu.MemorySpace.SMEM)
    grid_spec = pltpu.PrefetchScalarGridSpec(
        num_scalar_prefetch=2,
        grid=(nsteps,),
        in_specs=[
            pl.BlockSpec((tile, d), lambda t, ti, tj: (ti[t], 0)),   # row block
            pl.BlockSpec((tile, d), lambda t, ti, tj: (tj[t], 0)),   # col block
            pl.BlockSpec((tile, 1), lambda t, ti, tj: (ti[t], 0)),   # ||x||^2 col
            pl.BlockSpec((1, tile), lambda t, ti, tj: (0, tj[t])),   # ||x||^2 row
            pl.BlockSpec((tile, 1), lambda t, ti, tj: (ti[t], 0)),   # weight col
            pl.BlockSpec((1, tile), lambda t, ti, tj: (0, tj[t])),   # weight row
            smem,                                                    # -1/bandwidth
        ],
        out_specs=smem,
        scratch_shapes=[pltpu.SMEM((1, 1), jnp.float32)],
    )

    # Raise the scoped VMEM limit only when the double-buffered feature blocks
    # actually need it (defaults: 16/32/32 MiB on v5e/v6e/v7x; v7x physical is
    # only 64 MiB, so stay conservative).
    blk_bytes = 2 * 2 * tile * d * total_p.dtype.itemsize
    vmem_limit = 64 * 1024 * 1024 if blk_bytes > 24 * 1024 * 1024 else None

    out = pl.pallas_call(
        kern,
        out_shape=jax.ShapeDtypeStruct((1, 1), jnp.float32),
        grid_spec=grid_spec,
        compiler_params=pltpu.CompilerParams(
            dimension_semantics=("arbitrary",),
            vmem_limit_bytes=vmem_limit,
        ),
    )(tile_i, tile_j, total_p, total_p, sq_col, sq_row, w_col, w_row,
      neg_inv_bw)
    return out[0, 0]


# ---------------------------------------------------------------------------
# linear path
# ---------------------------------------------------------------------------
def _mmd_linear_kernel(src_ref, tgt_ref, out_ref):
    x = src_ref[...].astype(jnp.float32)
    y = tgt_ref[...].astype(jnp.float32)
    delta = (jnp.mean(x, axis=0, keepdims=True)
             - jnp.mean(y, axis=0, keepdims=True))                  # [1, D]
    out_ref[0, 0] = jnp.sum(delta * delta)


def _mmd_linear(source, target):
    vmem = pl.BlockSpec(memory_space=pltpu.MemorySpace.VMEM)
    smem = pl.BlockSpec(memory_space=pltpu.MemorySpace.SMEM)
    out = pl.pallas_call(
        _mmd_linear_kernel,
        out_shape=jax.ShapeDtypeStruct((1, 1), jnp.float32),
        in_specs=[vmem, vmem],
        out_specs=smem,
    )(source, target)
    return out[0, 0]


class MMDLoss:
    """JAX/Pallas port of MMD_loss.forward (fix_sigma is always None)."""

    def __init__(self, kernel_type='rbf', kernel_mul=2.0, kernel_num=5):
        self.kernel_type = kernel_type
        self.kernel_mul = float(kernel_mul)
        self.kernel_num = int(kernel_num)
        self.fix_sigma = None

    def __call__(self, source, target):
        if self.kernel_type == 'linear':
            return _mmd_linear(source, target)
        # rbf (default)
        return _mmd_rbf(source, target,
                        kernel_mul=self.kernel_mul,
                        kernel_num=self.kernel_num)


# ---------------------------------------------------------------------------
# Pure-JAX references mirroring the PyTorch code exactly.
# ---------------------------------------------------------------------------
def _mmd_rbf_reference(source, target, kernel_mul=2.0, kernel_num=5):
    n_samples = source.shape[0] + target.shape[0]
    total = jnp.concatenate([source, target], axis=0).astype(jnp.float32)
    diff = total[None, :, :] - total[:, None, :]
    l2 = jnp.sum(diff ** 2, axis=2)
    bandwidth = jnp.sum(l2) / (n_samples ** 2 - n_samples)
    bandwidth = bandwidth / (kernel_mul ** (kernel_num // 2))
    kernels = sum(jnp.exp(-l2 / (bandwidth * kernel_mul ** i))
                  for i in range(kernel_num))
    b = source.shape[0]
    return (jnp.mean(kernels[:b, :b]) + jnp.mean(kernels[b:, b:])
            - jnp.mean(kernels[:b, b:]) - jnp.mean(kernels[b:, :b]))


def _mmd_linear_reference(source, target):
    delta = jnp.mean(source.astype(jnp.float32), axis=0) \
        - jnp.mean(target.astype(jnp.float32), axis=0)
    return jnp.sum(delta * delta)


if __name__ == "__main__":
    key = jax.random.PRNGKey(0)
    k1, k2, k3, k4 = jax.random.split(key, 4)

    # Small shapes consistent with the module: batch=8 rows, hidden=32.
    B, D = 8, 32
    source = jax.random.normal(k1, (B, D), dtype=jnp.float32)
    target = jax.random.normal(k2, (B, D), dtype=jnp.float32) + 0.5

    # rbf path (single-tile grid)
    mmd_rbf = MMDLoss(kernel_type='rbf', kernel_mul=2.0, kernel_num=5)
    loss_rbf = jax.block_until_ready(mmd_rbf(source, target))
    ref_rbf = _mmd_rbf_reference(source, target)
    assert np.isfinite(float(loss_rbf)), "non-finite rbf loss"
    np.testing.assert_allclose(float(loss_rbf), float(ref_rbf),
                               rtol=1e-3, atol=1e-3)

    # linear path
    mmd_lin = MMDLoss(kernel_type='linear')
    loss_lin = jax.block_until_ready(mmd_lin(source, target))
    ref_lin = _mmd_linear_reference(source, target)
    assert np.isfinite(float(loss_lin)), "non-finite linear loss"
    np.testing.assert_allclose(float(loss_lin), float(ref_lin),
                               rtol=1e-3, atol=1e-3)

    # Exercise the multi-tile triangular grid (2x2 blocks -> 3 scheduled tiles)
    # with uneven source/target sizes and row padding.
    B2, M2, D2 = 96, 80, 64
    src2 = jax.random.normal(k3, (B2, D2), dtype=jnp.float32)
    tgt2 = jax.random.normal(k4, (M2, D2), dtype=jnp.float32) * 1.3 + 0.25
    loss2 = jax.block_until_ready(
        _mmd_rbf(src2, tgt2, kernel_mul=2.0, kernel_num=5, tile=128))
    ref2 = _mmd_rbf_reference(src2, tgt2)
    assert np.isfinite(float(loss2)), "non-finite tiled rbf loss"
    np.testing.assert_allclose(float(loss2), float(ref2), rtol=1e-3, atol=1e-3)

    print("KERNEL_OK")
</pallas_src>

<mosaic_0001>
module attributes {stable_mosaic.version = 11 : i64} {
  func.func @_mmd_rbf_tile_kernel(%arg0: i32, %arg1: memref<1xi32, #tpu.memory_space<smem>>, %arg2: memref<1xi32, #tpu.memory_space<smem>>, %arg3: memref<16x32xf32, #tpu.memory_space<vmem>>, %arg4: memref<16x32xf32, #tpu.memory_space<vmem>>, %arg5: memref<16x1xf32, #tpu.memory_space<vmem>>, %arg6: memref<1x16xf32, #tpu.memory_space<vmem>>, %arg7: memref<16x1xf32, #tpu.memory_space<vmem>>, %arg8: memref<1x16xf32, #tpu.memory_space<vmem>>, %arg9: memref<1x1xf32, #tpu.memory_space<smem>>, %arg10: memref<1x1xf32, #tpu.memory_space<smem>>, %arg11: memref<1x1xf32, #tpu.memory_space<smem>>) attributes {dimension_semantics = [#tpu.dimension_semantics<arbitrary>], iteration_bounds = array<i64: 1>, scalar_prefetch = 2 : i64, scratch_operands = 1 : i64, tpu.core_type = #tpu.core_type<tc>, window_params = [{transform_indices = @transform_0, window_bounds = array<i64: 16, 32>}, {transform_indices = @transform_1, window_bounds = array<i64: 16, 32>}, {transform_indices = @transform_2, window_bounds = array<i64: 16, 1>}, {transform_indices = @transform_3, window_bounds = array<i64: 1, 16>}, {transform_indices = @transform_4, window_bounds = array<i64: 16, 1>}, {transform_indices = @transform_5, window_bounds = array<i64: 1, 16>}, {transform_indices = @transform_6, window_bounds = array<i64: 1, 1>}, {transform_indices = @transform_7, window_bounds = array<i64: 1, 1>}]} {
    %0 = arith.index_cast %arg0 : i32 to index
    %1 = memref.load %arg1[%0] : memref<1xi32, #tpu.memory_space<smem>>
    %2 = arith.index_cast %arg0 : i32 to index
    %3 = memref.load %arg2[%2] : memref<1xi32, #tpu.memory_space<smem>>
    %c0_i32 = arith.constant 0 : i32
    %4 = arith.cmpi eq, %arg0, %c0_i32 : i32
    %5 = arith.extui %4 : i1 to i32
    %c0_i32_0 = arith.constant 0 : i32
    %6 = arith.cmpi ne, %5, %c0_i32_0 : i32
    scf.if %6 {
      %cst_31 = arith.constant 0.000000e+00 : f32
      %c0_32 = arith.constant 0 : index
      %c0_33 = arith.constant 0 : index
      %66 = memref.load %arg11[%c0_32, %c0_33] : memref<1x1xf32, #tpu.memory_space<smem>>
      memref.store %cst_31, %arg11[%c0_32, %c0_33] : memref<1x1xf32, #tpu.memory_space<smem>>
    } else {
    }
    %c0 = arith.constant 0 : index
    %c0_1 = arith.constant 0 : index
    %7 = vector.load %arg3[%c0, %c0_1] : memref<16x32xf32, #tpu.memory_space<vmem>>, vector<16x32xf32>
    %c0_2 = arith.constant 0 : index
    %c0_3 = arith.constant 0 : index
    %8 = vector.load %arg4[%c0_2, %c0_3] : memref<16x32xf32, #tpu.memory_space<vmem>>, vector<16x32xf32>
    %cst = arith.constant dense<0.000000e+00> : vector<16x16xf32>
    %9 = tpu.matmul %7, %8, %cst {dimension_numbers = #tpu.dot_dimension_numbers<[1], [1], [0], [0], [0, 0, 1, 0], [], []>} : vector<16x32xf32>, vector<16x32xf32>, vector<16x16xf32> -> vector<16x16xf32>
    %c0_4 = arith.constant 0 : index
    %c0_5 = arith.constant 0 : index
    %10 = vector.load %arg5[%c0_4, %c0_5] : memref<16x1xf32, #tpu.memory_space<vmem>>, vector<16x1xf32>
    %c0_6 = arith.constant 0 : index
    %c0_7 = arith.constant 0 : index
    %11 = vector.load %arg6[%c0_6, %c0_7] : memref<1x16xf32, #tpu.memory_space<vmem>>, vector<1x16xf32>
    %12 = vector.broadcast %10 : vector<16x1xf32> to vector<16x16xf32>
    %13 = vector.broadcast %11 : vector<1x16xf32> to vector<16x16xf32>
    %14 = arith.addf %12, %13 : vector<16x16xf32>
    %cst_8 = arith.constant 2.000000e+00 : f32
    %15 = vector.broadcast %cst_8 : f32 to vector<16x16xf32>
    %16 = arith.mulf %15, %9 : vector<16x16xf32>
    %17 = arith.subf %14, %16 : vector<16x16xf32>
    %cst_9 = arith.constant 0.000000e+00 : f32
    %18 = vector.broadcast %cst_9 : f32 to vector<16x16xf32>
    %19 = arith.maximumf %17, %18 : vector<16x16xf32>
    %c0_10 = arith.constant 0 : index
    %c0_11 = arith.constant 0 : index
    %20 = memref.load %arg9[%c0_10, %c0_11] : memref<1x1xf32, #tpu.memory_space<smem>>
    %cst_12 = arith.constant 0.000000e+00 : f32
    %21 = vector.broadcast %cst_12 : f32 to vector<16x16xf32>
    %cst_13 = arith.constant 1.000000e+00 : f32
    %22 = arith.mulf %20, %cst_13 : f32
    %23 = vector.broadcast %22 : f32 to vector<16x16xf32>
    %24 = arith.mulf %19, %23 : vector<16x16xf32>
    %25 = math.exp %24 : vector<16x16xf32>
    %26 = arith.addf %21, %25 : vector<16x16xf32>
    %cst_14 = arith.constant 5.000000e-01 : f32
    %27 = arith.mulf %20, %cst_14 : f32
    %28 = vector.broadcast %27 : f32 to vector<16x16xf32>
    %29 = arith.mulf %19, %28 : vector<16x16xf32>
    %30 = math.exp %29 : vector<16x16xf32>
    %31 = arith.addf %26, %30 : vector<16x16xf32>
    %cst_15 = arith.constant 2.500000e-01 : f32
    %32 = arith.mulf %20, %cst_15 : f32
    %33 = vector.broadcast %32 : f32 to vector<16x16xf32>
    %34 = arith.mulf %19, %33 : vector<16x16xf32>
    %35 = math.exp %34 : vector<16x16xf32>
    %36 = arith.addf %31, %35 : vector<16x16xf32>
    %cst_16 = arith.constant 1.250000e-01 : f32
    %37 = arith.mulf %20, %cst_16 : f32
    %38 = vector.broadcast %37 : f32 to vector<16x16xf32>
    %39 = arith.mulf %19, %38 : vector<16x16xf32>
    %40 = math.exp %39 : vector<16x16xf32>
    %41 = arith.addf %36, %40 : vector<16x16xf32>
    %cst_17 = arith.constant 6.250000e-02 : f32
    %42 = arith.mulf %20, %cst_17 : f32
    %43 = vector.broadcast %42 : f32 to vector<16x16xf32>
    %44 = arith.mulf %19, %43 : vector<16x16xf32>
    %45 = math.exp %44 : vector<16x16xf32>
    %46 = arith.addf %41, %45 : vector<16x16xf32>
    %c0_18 = arith.constant 0 : index
    %c0_19 = arith.constant 0 : index
    %47 = vector.load %arg7[%c0_18, %c0_19] : memref<16x1xf32, #tpu.memory_space<vmem>>, vector<16x1xf32>
    %48 = vector.broadcast %47 : vector<16x1xf32> to vector<16x16xf32>
    %49 = arith.mulf %46, %48 : vector<16x16xf32>
    %c0_20 = arith.constant 0 : index
    %c0_21 = arith.constant 0 : index
    %50 = vector.load %arg8[%c0_20, %c0_21] : memref<1x16xf32, #tpu.memory_space<vmem>>, vector<1x16xf32>
    %51 = vector.broadcast %50 : vector<1x16xf32> to vector<16x16xf32>
    %52 = arith.mulf %49, %51 : vector<16x16xf32>
    %53 = vector.shape_cast %52 : vector<16x16xf32> to vector<1x16x16xf32>
    %cst_22 = arith.constant dense<0.000000e+00> : vector<1xf32>
    %54 = vector.multi_reduction <add>, %53, %cst_22 [1, 2] : vector<1x16x16xf32> to vector<1xf32>
    %55 = vector.shape_cast %54 : vector<1xf32> to vector<1x1x1xf32>
    %56 = vector.extract %55[0, 0, 0] : f32 from vector<1x1x1xf32>
    %57 = arith.cmpi eq, %1, %3 : i32
    %cst_23 = arith.constant 1.000000e+00 : f32
    %cst_24 = arith.constant 2.000000e+00 : f32
    %58 = arith.select %57, %cst_23, %cst_24 : f32
    %c0_25 = arith.constant 0 : index
    %c0_26 = arith.constant 0 : index
    %59 = memref.load %arg11[%c0_25, %c0_26] : memref<1x1xf32, #tpu.memory_space<smem>>
    %60 = arith.mulf %58, %56 : f32
    %61 = arith.addf %59, %60 : f32
    %c0_27 = arith.constant 0 : index
    %c0_28 = arith.constant 0 : index
    %62 = memref.load %arg11[%c0_27, %c0_28] : memref<1x1xf32, #tpu.memory_space<smem>>
    memref.store %61, %arg11[%c0_27, %c0_28] : memref<1x1xf32, #tpu.memory_space<smem>>
    %c0_i32_29 = arith.constant 0 : i32
    %63 = arith.cmpi eq, %arg0, %c0_i32_29 : i32
    %64 = arith.extui %63 : i1 to i32
    %c0_i32_30 = arith.constant 0 : i32
    %65 = arith.cmpi ne, %64, %c0_i32_30 : i32
    scf.if %65 {
      %c0_31 = arith.constant 0 : index
      %c0_32 = arith.constant 0 : index
      %66 = memref.load %arg11[%c0_31, %c0_32] : memref<1x1xf32, #tpu.memory_space<smem>>
      %c0_33 = arith.constant 0 : index
      %c0_34 = arith.constant 0 : index
      %67 = memref.load %arg10[%c0_33, %c0_34] : memref<1x1xf32, #tpu.memory_space<smem>>
      memref.store %66, %arg10[%c0_33, %c0_34] : memref<1x1xf32, #tpu.memory_space<smem>>
    } else {
    }
    return
  }
  func.func @transform_0(%arg0: i32, %arg1: memref<1xi32, #tpu.memory_space<smem>>, %arg2: memref<1xi32, #tpu.memory_space<smem>>) -> (i32, i32) {
    %0 = arith.index_cast %arg0 : i32 to index
    %1 = memref.load %arg1[%0] : memref<1xi32, #tpu.memory_space<smem>>
    %c0_i32 = arith.constant 0 : i32
    %c0_i32_0 = arith.constant 0 : i32
    return %1, %c0_i32 : i32, i32
  }
  func.func @transform_1(%arg0: i32, %arg1: memref<1xi32, #tpu.memory_space<smem>>, %arg2: memref<1xi32, #tpu.memory_space<smem>>) -> (i32, i32) {
    %0 = arith.index_cast %arg0 : i32 to index
    %1 = memref.load %arg2[%0] : memref<1xi32, #tpu.memory_space<smem>>
    %c0_i32 = arith.constant 0 : i32
    %c0_i32_0 = arith.constant 0 : i32
    return %1, %c0_i32 : i32, i32
  }
  func.func @transform_2(%arg0: i32, %arg1: memref<1xi32, #tpu.memory_space<smem>>, %arg2: memref<1xi32, #tpu.memory_space<smem>>) -> (i32, i32) {
    %0 = arith.index_cast %arg0 : i32 to index
    %1 = memref.load %arg1[%0] : memref<1xi32, #tpu.memory_space<smem>>
    %c0_i32 = arith.constant 0 : i32
    %c0_i32_0 = arith.constant 0 : i32
    return %1, %c0_i32 : i32, i32
  }
  func.func @transform_3(%arg0: i32, %arg1: memref<1xi32, #tpu.memory_space<smem>>, %arg2: memref<1xi32, #tpu.memory_space<smem>>) -> (i32, i32) {
    %0 = arith.index_cast %arg0 : i32 to index
    %1 = memref.load %arg2[%0] : memref<1xi32, #tpu.memory_space<smem>>
    %c0_i32 = arith.constant 0 : i32
    %c0_i32_0 = arith.constant 0 : i32
    return %c0_i32, %1 : i32, i32
  }
  func.func @transform_4(%arg0: i32, %arg1: memref<1xi32, #tpu.memory_space<smem>>, %arg2: memref<1xi32, #tpu.memory_space<smem>>) -> (i32, i32) {
    %0 = arith.index_cast %arg0 : i32 to index
    %1 = memref.load %arg1[%0] : memref<1xi32, #tpu.memory_space<smem>>
    %c0_i32 = arith.constant 0 : i32
    %c0_i32_0 = arith.constant 0 : i32
    return %1, %c0_i32 : i32, i32
  }
  func.func @transform_5(%arg0: i32, %arg1: memref<1xi32, #tpu.memory_space<smem>>, %arg2: memref<1xi32, #tpu.memory_space<smem>>) -> (i32, i32) {
    %0 = arith.index_cast %arg0 : i32 to index
    %1 = memref.load %arg2[%0] : memref<1xi32, #tpu.memory_space<smem>>
    %c0_i32 = arith.constant 0 : i32
    %c0_i32_0 = arith.constant 0 : i32
    return %c0_i32, %1 : i32, i32
  }
  func.func @transform_6(%arg0: i32, %arg1: memref<1xi32, #tpu.memory_space<smem>>, %arg2: memref<1xi32, #tpu.memory_space<smem>>) -> (i32, i32) {
    %c0_i32 = arith.constant 0 : i32
    %c0_i32_0 = arith.constant 0 : i32
    %c0_i32_1 = arith.constant 0 : i32
    return %c0_i32, %c0_i32_0 : i32, i32
  }
  func.func @transform_7(%arg0: i32, %arg1: memref<1xi32, #tpu.memory_space<smem>>, %arg2: memref<1xi32, #tpu.memory_space<smem>>) -> (i32, i32) {
    %c0_i32 = arith.constant 0 : i32
    %c0_i32_0 = arith.constant 0 : i32
    %c0_i32_1 = arith.constant 0 : i32
    return %c0_i32, %c0_i32_0 : i32, i32
  }
}

</mosaic_0001>

<bundles_post_ra>
// kernel: tpu_custom_call.1
= control target key start
LH: loop header
LB: loop body
LE: loop exit
PB: predicated region body
PF: predicated region fallthrough
CT: control target
= control target key end

     0   :  { %s609_s0 = inlined_call_operand.<no memory space> [shape: s32[1], index: 0, kind: input, shape index: {}]   ;;  %s610_s1 = inlined_call_operand.<no memory space> [shape: s32[1], index: 1, kind: input, shape index: {}]   ;;  %s611_s2 = inlined_call_operand.vmem [shape: f32[16,32], index: 2, kind: input, shape index: {}]   ;;  %s612_s3 = inlined_call_operand.vmem [shape: f32[16,32], index: 3, kind: input, shape index: {}]   ;;  %s613_s4 = inlined_call_operand.vmem [shape: f32[16,1], index: 4, kind: input, shape index: {}]   ;;  %s614_s5 = inlined_call_operand.vmem [shape: f32[1,16], index: 5, kind: input, shape index: {}]   ;;  %s615_s6 = inlined_call_operand.vmem [shape: f32[16,1], index: 6, kind: input, shape index: {}]   ;;  %s616_s7 = inlined_call_operand.vmem [shape: f32[1,16], index: 7, kind: input, shape index: {}]   ;;  %s617_s8 = inlined_call_operand.<no memory space> [shape: f32[1,1], index: 8, kind: input, shape index: {}]   ;;  %s618_s9 = inlined_call_operand.hbm [shape: f32[1,1], index: 9, kind: output, shape index: {}]  }
   0x1   :  { %s419_s11 = sshll.u32 %s610_s1, 1  ;;  %s417_s14 = sshll.u32 %s609_s0, 1 }
   0x2   :  { %17 = vsyncpa [#allocation8], 0  ;;  %p116_p0 = scmp.lt.s32.totalorder %s419_s11, 1  ;;  %p108_p1 = scmp.lt.s32.totalorder %s417_s14, 1  ;;  %v486_v0 = vmov 0   ;;  %vm160_vm0 = vcmask 261120   ;;  %v276_v20 = vstv %s617_s8 }
   0x3   :  { %452 = vset.pattern.permute.xlu0 %v486_v0  ;;  %453 = vset.pattern.permute.xlu1 %v486_v0  ;;  %vm443_vm1 = vmpackc.low %vm160_vm0, %vm160_vm0  ;;  %p131_p2 = scmp.lt.s32.totalorder %s610_s1, 0  ;;  %s295_s17 = smul.f32 0.25, %s617_s8  ;;  %vm348_vm2 = vcmask 130048  }
   0x4   :  { %s620_s11 = smov (!%p116_p0, %s419_s11), 1  ;;  %s622_s14 = smov (!%p108_p1, %s417_s14), 1 }
   0x5   :  { %s420_s15 = sshll.u32 %s620_s11, 3  ;;  %s418_s19 = sshll.u32 %s622_s14, 3  ;;  %v296_v22 = vstv %s295_s17 }
   0x6   :  { %s119_s18 = scalar_lea.vmem %s612_s3, %s420_s15  ;;  %s111_s22 = scalar_lea.vmem %s611_s2, %s418_s19 }
   0x7   :  { %v158_v1 = vld [vmem:[%s119_s18] sm:$0xff]  ;;  %v159_v2 = vld [vmem:[%s119_s18 + $0x8] sm:$0xff]  ;;  %s127_s25 = scalar_lea.vmem %s613_s4, %s418_s19  ;;  %s140_s3 = scalar_lea.vmem %s615_s6, %s418_s19 }
   0x8   :  { %v442_v3 = vpack.c.bf16 %v159_v2, %v158_v1  ;;  %v156_v4 = vld [vmem:[%s111_s22] sm:$0xff]  ;;  %v249_v7 = vld [vmem:[%s127_s25 + $0x8] sm:$0xff]  ;;  %s566_s29 = scalar_select %p131_p2, %s610_s1, 0 }
   0x9   :  { %v248_v5 = vld [vmem:[%s127_s25] sm:$0xff]  ;;  %439 = vmatprep.mubr.msk.f32.mxu0 %vm160_vm0, %v156_v4  ;;  %v326_v8 = vld [vmem:[%s140_s3 + $0x8] sm:$0xff]  ;;  %s285_s14 = smul.f32 0.5, %s617_s8  ;;  %p361_p3 = scmp.eq.s32.totalorder %s609_s0, %s610_s1 }
   0xa   :  { %253 = vperm.xlu0 %452, %v248_v5   ;;  %v325_v6 = vld [vmem:[%s140_s3] sm:$0xff]  ;;  %444 = vmatprep.subr.msk.bf16.mxu0 %vm443_vm1, %v442_v3  ;;  %v157_v9 = vld [vmem:[%s111_s22 + $0x8] sm:$0xff]  ;;  %s133_s11 = scalar_lea.vmem %s614_s5, %s566_s29  ;;  %s305_s5 = smul.f32 0.125, %s617_s8 }
   0xb   :  { %329 = vperm.xlu1 %453, %v325_v6   ;;  %447 = vmatpush3.bf16.xpose.msk.msra.mxu0 %vm443_vm1, %v442_v3  ;;  %v429_v11 = vld [vmem:[%s133_s11] ss:$0 sm:$0xff]  ;;  %v286_v21 = vstv %s285_s14  ;;  %s315_s24 = smul.f32 0.0625, %s617_s8  ;;  %s146_s26 = scalar_lea.vmem %s616_s7, %s566_s29 }
   0xc   :  { %v306_v29 = vstv %s305_s5  ;;  %v430_v3 = vld [vmem:[%s146_s26] ss:$0 sm:$0xff]  ;;  %s362_s4 = scalar_select %p361_p3, 1.0, 2.0 }
   0xd   :  { %v316_v32 = vstv %s315_s24  ;;  %s474_s10 = scalar_lea.hbm %s618_s9, 16 }
   0xe   :  { %258 = vperm.xlu0 %452, %v249_v7   ;;  %p475_p4 = scmp.ne.s32.totalorder %s618_s9, %s474_s10  ;;  %p478_p5 = scmp.lt.u32.totalorder %s474_s10, %s618_s9 }
   0xf   :  { %334 = vperm.xlu1 %453, %v326_v8  }
  0x10   :  { %p480_p6 = pnand %p478_p5, %p475_p4 }
  0x12   :  { %440 = vmatmul.mubr.msk.f32.vlgmr.msra.gmra.mrb[0].mxu0 %vm160_vm0, %v157_v9 }
  0x89   :  { %v254_v10 = vpop.permute.xlu0 %253 }
  0x8a   :  { %v267_v17 = vadd.f32 %v429_v11, %v254_v10  ;;  %v330_v57 = vpop.permute.xlu1 %329 }
  0x8d   :  { %v259_v12 = vpop.permute.xlu0 %258 }
  0x8e   :  { %v268_v14 = vadd.f32 %v429_v11, %v259_v12  ;;  %v335_v4 = vpop.permute.xlu1 %334 }
  0xe5   :  { %v441_v13 = vpop.f32.mrb[0].mxu0 }
  0xe6   :  { %v270_v15 = vmul.f32 2.0, %v441_v13  ;;  %v239_v16 = vpop.f32.mrb[1].mxu0 }
  0xe7   :  { %v269_v18 = vmul.f32 2.0, %v239_v16 }
  0xe8   :  { %v272_v19 = vsub.f32 %v268_v14, %v270_v15 }
  0xe9   :  { %v271_v23 = vsub.f32 %v267_v17, %v269_v18 }
  0xea   :  { %v274_v24 = vmax.f32 %v272_v19, 0.0 }
  0xeb   :  { %v273_v25 = vmax.f32 %v271_v23, 0.0 }
  0xec   :  { %v278_v26 = vmul.f32 %v276_v20, %v274_v24  ;;  %v288_v27 = vmul.f32 %v286_v21, %v274_v24  ;;  %v298_v28 = vmul.f32 %v296_v22, %v274_v24  ;;  %v308_v39 = vmul.f32 %v306_v29, %v274_v24 }
  0xed   :  { %v277_v30 = vmul.f32 %v276_v20, %v273_v25  ;;  %v287_v31 = vmul.f32 %v286_v21, %v273_v25  ;;  %v297_v36 = vmul.f32 %v296_v22, %v273_v25  ;;  %v307_v38 = vmul.f32 %v306_v29, %v273_v25 }
  0xee   :  { %v281_v33 = vmul.f32 1.442695, %v278_v26  ;;  %v291_v34 = vmul.f32 1.442695, %v288_v27  ;;  %v301_v35 = vmul.f32 1.442695, %v298_v28  ;;  %v317_v41 = vmul.f32 %v316_v32, %v273_v25 }
  0xef   :  { %v279_v37 = vmul.f32 1.442695, %v277_v30  ;;  %v289_v40 = vmul.f32 1.442695, %v287_v31  ;;  %v299_v42 = vmul.f32 1.442695, %v297_v36  ;;  %v318_v43 = vmul.f32 %v316_v32, %v274_v24 }
  0xf0   :  { %454 = vpow2.f32 %v281_v33  ;;  %v309_v44 = vmul.f32 1.442695, %v307_v38  ;;  %v311_v45 = vmul.f32 1.442695, %v308_v39  ;;  %v319_v46 = vmul.f32 1.442695, %v317_v41 }
  0xf1   :  { %456 = vpow2.f32 %v291_v34  ;;  %v321_v47 = vmul.f32 1.442695, %v318_v43 }
  0xf2   :  { %458 = vpow2.f32 %v301_v35 }
  0xf3   :  { %460 = vpow2.f32 %v279_v37 }
  0xf4   :  { %462 = vpow2.f32 %v289_v40 }
  0xf5   :  { %464 = vpow2.f32 %v299_v42 }
  0xf6   :  { %466 = vpow2.f32 %v309_v44 }
  0xf7   :  { %468 = vpow2.f32 %v311_v45 }
  0xf8   :  { %470 = vpow2.f32 %v319_v46 }
  0xf9   :  { %472 = vpow2.f32 %v321_v47 }
  0xfa   :  { %v455_v48 = vpop.eup %454 }
  0xfb   :  { %v457_v49 = vpop.eup %456 }
  0xfc   :  { %v459_v50 = vpop.eup %458  ;;  %v294_v51 = vadd.f32 %v457_v49, %v455_v48 }
  0xfd   :  { %v461_v52 = vpop.eup %460 }
  0xfe   :  { %v463_v53 = vpop.eup %462  ;;  %v304_v55 = vadd.f32 %v459_v50, %v294_v51 }
  0xff   :  { %v293_v54 = vadd.f32 %v463_v53, %v461_v52  ;;  %v465_v56 = vpop.eup %464 }
 0x100   :  { %v467_v58 = vpop.eup %466 }
 0x101   :  { %v303_v59 = vadd.f32 %v465_v56, %v293_v54  ;;  %v469_v60 = vpop.eup %468 }
 0x102   :  { %v471_v61 = vpop.eup %470  ;;  %v314_v63 = vadd.f32 %v469_v60, %v304_v55 }
 0x103   :  { %v313_v62 = vadd.f32 %v467_v58, %v303_v59  ;;  %v473_v0 = vpop.eup %472 }
 0x104   :  { %v324_v2 = vadd.f32 %v473_v0, %v314_v63 }
 0x105   :  { %v323_v1 = vadd.f32 %v471_v61, %v313_v62 }
 0x106   :  { %v338_v6 = vmul.f32 %v335_v4, %v324_v2 }
 0x107   :  { %v337_v5 = vmul.f32 %v330_v57, %v323_v1 }
 0x108   :  { %v347_v8 = vmul.f32 %v430_v3, %v338_v6 }
 0x109   :  { %v346_v7 = vmul.f32 %v430_v3, %v337_v5 }
 0x10a   :  { %v350_v10 = vsel %vm348_vm2, %v347_v8, 0.0 }
 0x10b   :  { %v349_v9 = vsel %vm348_vm2, %v346_v7, 0.0 }
 0x10c   :  { %v351_v11 = vadd.f32 %v350_v10, %v349_v9 }
 0x10e   :  { %352 = vadd.xlane.f32.xlu0 %v351_v11 }
 0x19b   :  { %v353_v12 = vpop.xlane.xlu0 %352 }
 0x19c   :  { %v354_v13 = vrot.slane %v353_v12, 4 }
 0x19e   :  { %v355_v14 = vadd.f32 %v354_v13, %v353_v12 }
 0x1a0   :  { %v356_v15 = vrot.slane %v355_v14, 2 }
 0x1a2   :  { %v357_v16 = vadd.f32 %v356_v15, %v355_v14 }
 0x1a4   :  { %v358_v17 = vrot.slane %v357_v16, 1 }
 0x1a6   :  { %v359_v18 = vadd.f32 %v358_v17, %v357_v16 }
 0x1a8   :  { %448 = vpush %v359_v18 }
 0x1d9   :  { %s449_s28 = spop %448 }
 0x1da   :  { %s364_s6 = smul.f32 %s449_s28, %s362_s4 }
 0x1dc   :  { %373 = sst [smem:[#allocation7]] %s364_s6 }
 0x1dd   :  { %483 = shalt.err (!%p480_p6)
}
 0x1de   :  { %s487_s15 = smov [#allocation7]  }
 0x1df   :  { %381 = dma.smem_to_hbm %s487_s15, 16, %s618_s9, [#allocation8]  }
 0x1e0   :  { %484 = dma.done.wait [#allocation8], 16  }
 0x1e1   :  { %485 = vsyncadd [#allocation8], 4294967280 }
 0x1e2   :  { %385 = sfence }
 0x1e3   :  { %386 = vsyncpa [#allocation8], 1 }

</bundles_post_ra>
